<compile_context>
chip_gen: v5e
topology: v5e:2x2
jax: 0.10.0
libtpu: 0.0.40
codegen_flags: <defaults>
</compile_context>

<pallas_src>
import jax
import jax.numpy as jnp
from jax.experimental import pallas as pl
from jax.experimental.pallas import tpu as pltpu


def _se_kernel_nchw(x_ref, w1_ref, w2_ref, o_ref):
    """Block (B, C, HW): NCHW layout, spatial on lanes, no transposes anywhere.

    Per-image 2D processing (pool -> fc1 -> relu -> fc2 -> sigmoid -> scale).
    The block is only ever touched in its native dtype: one read for the pool,
    one fused read-scale-store; it is never materialized in f32.
    """
    blk_b, _, hw = x_ref.shape
    inv_hw = 1.0 / hw
    f32 = jnp.float32
    w1 = w1_ref[...]                         # (C_red, C), used exactly as given
    w2 = w2_ref[...]                         # (C, C_red)
    exact_f32 = x_ref.dtype == jnp.float32
    if not exact_f32:
        ones_col = jnp.ones((hw, 1), dtype=x_ref.dtype)

    # TODO(synk): for very large C (>=1024) with many packed images the per-b
    # excitation re-streams the weights through the MXU; prefer the NHWC path
    # (batched excitation, lane-dense stores) for those late-stage shapes.
    for b in range(blk_b):                   # static unroll; blk_b <= 16
        xb = x_ref[b]                        # (C, HW), native dtype
        if exact_f32:
            pooled = jnp.sum(xb, axis=-1, keepdims=True) * inv_hw        # exact
        else:
            # bf16: MXU ones-matmul accumulates in f32 without ever
            # materializing the (C, HW) slab in f32.
            pooled = jnp.dot(xb, ones_col,
                             preferred_element_type=f32) * inv_hw        # (C, 1)
        h = jnp.maximum(
            jnp.dot(w1, pooled.astype(w1.dtype),
                    preferred_element_type=f32), 0.0)                    # (Cr, 1)
        s = jax.nn.sigmoid(
            jnp.dot(w2, h.astype(w2.dtype),
                    preferred_element_type=f32))                         # (C, 1)
        o_ref[b] = xb * s.astype(xb.dtype)   # native-dtype scale, single store


def _se_kernel_nhwc(x_ref, w1_ref, w2_ref, o_ref):
    """Block (B, HW, C): native channels-last layout, channels on lanes.

    Lane-dense loads/stores when C is a multiple of 128 (late SE stages).  The
    excitation is batched over the packed images; the only transposes are of
    the tiny (B, C) pooled / scale arrays and ride the otherwise-idle XLU.
    """
    blk_b, hw, _ = x_ref.shape
    inv_hw = 1.0 / hw
    f32 = jnp.float32
    w1 = w1_ref[...]
    w2 = w2_ref[...]
    exact_f32 = x_ref.dtype == jnp.float32
    if not exact_f32:
        ones_row = jnp.ones((1, hw), dtype=x_ref.dtype)

    rows = []
    for b in range(blk_b):                   # static unroll; blk_b <= 16
        xb = x_ref[b]                        # (HW, C), native dtype
        if exact_f32:
            rows.append(jnp.sum(xb, axis=0, keepdims=True))              # exact
        else:
            rows.append(jnp.dot(ones_row, xb, preferred_element_type=f32))
    pooled = rows[0] if blk_b == 1 else jnp.concatenate(rows, axis=0)
    pooled = pooled * inv_hw                                   # (B, C) f32

    # Column-vector excitation so the 1x1-conv weights are used exactly as
    # given (no weight transposes in the wrapper or the kernel).
    p_cb = jnp.transpose(pooled).astype(w1.dtype)              # (C, B), tiny
    h = jnp.maximum(jnp.dot(w1, p_cb, preferred_element_type=f32), 0.0)
    s = jax.nn.sigmoid(jnp.dot(w2, h.astype(w2.dtype),
                               preferred_element_type=f32))    # (C, B) f32
    s_bc = jnp.transpose(s).astype(x_ref.dtype)                # (B, C), tiny

    for b in range(blk_b):
        o_ref[b] = x_ref[b] * s_bc[b:b + 1, :]                 # lane-dense store


def _padded_tile_bytes(rows, cols, itemsize):
    # VMEM tiles pad the minor dim to 128 lanes and the 2nd-minor to 8 sublanes.
    return (-(-rows // 8) * 8) * (-(-cols // 128) * 128) * itemsize


def _pick_batch_pack(n, per_image_bytes, *, target_bytes=4 << 20, max_pack=16):
    """Largest divisor of n (<= max_pack) whose packed block stays <= target and
    that still leaves >= 2 grid steps (keeps both v7x TensorCores busy)."""
    best = 1
    for b in range(2, min(n, max_pack) + 1):
        if n % b:
            continue
        if b * per_image_bytes > target_bytes:
            break
        if n // b < 2:
            break
        best = b
    return best


def se_module_forward(x, w1, w2, *, data_format="NCHW", alias_input=False):
    """SEModule forward: x * sigmoid(fc2(relu(fc1(avg_pool(x))))).

    x:  (N, C, H, W) if data_format == "NCHW"  (PyTorch layout, default)
        (N, H, W, C) if data_format == "NHWC"  (channels-last: lane-dense
        stores for large C; use when the surrounding network already keeps
        activations NHWC on TPU -- no transposes are done anywhere here).
    w1: (C//r, C) fc1 1x1-conv weight (no bias)
    w2: (C, C//r) fc2 1x1-conv weight (no bias)
    alias_input: if the caller no longer needs x, reuse its HBM buffer for the
        output (no second activation allocation).
    """
    if data_format == "NCHW":
        N, C, H, W = x.shape
        HW = H * W
        x3 = x.reshape(N, C, HW)             # metadata-only reshape, no copy
        kernel = _se_kernel_nchw
        inner = (C, HW)                      # (sublane, lane) dims of a block
    elif data_format == "NHWC":
        N, H, W, C = x.shape
        HW = H * W
        x3 = x.reshape(N, HW, C)
        kernel = _se_kernel_nhwc
        inner = (HW, C)
    else:
        raise ValueError(f"unknown data_format {data_format!r}")

    C_red = w1.shape[0]
    assert w1.shape == (C_red, C) and w2.shape == (C, C_red), (w1.shape, w2.shape)

    # bf16 activations -> bf16 weights (halves weight DMA and resident VMEM;
    # the MXU still accumulates in f32 via preferred_element_type).
    if x.dtype == jnp.bfloat16:
        w1 = w1.astype(jnp.bfloat16)
        w2 = w2.astype(jnp.bfloat16)

    elem = x.dtype.itemsize
    w_elem = w1.dtype.itemsize

    # Pack several images per grid step so blocks land in the ~2-8 MiB sweet
    # spot (tiny late-stage SE blocks are otherwise grid-overhead bound).
    per_image_bytes = _padded_tile_bytes(inner[0], inner[1], elem)
    blk_b = _pick_batch_pack(N, per_image_bytes)
    grid = (N // blk_b,)
    block = (blk_b,) + inner

    # VMEM: 2 buffers for the x block + 2 for the out block (pipeline double
    # buffering), weights single-buffered, plus ~2 MiB compiler scratch.
    block_bytes = blk_b * per_image_bytes
    weight_bytes = (_padded_tile_bytes(w1.shape[0], w1.shape[1], w_elem)
                    + _padded_tile_bytes(w2.shape[0], w2.shape[1], w_elem))
    vmem_needed = 4 * block_bytes + weight_bytes + (2 << 20)
    try:
        vmem_physical = int(pltpu.get_tpu_info().vmem_capacity_bytes)
    except Exception:
        vmem_physical = 64 << 20             # conservative: assume v7x
    vmem_cap = (vmem_physical * 3) // 4      # ~48 MiB on v7x, ~96 MiB v5e/v6e
    vmem_limit = int(min(max(vmem_needed, 16 << 20), vmem_cap))
    # TODO(synk): if 4*block_bytes + weights exceeds vmem_cap even at blk_b=1
    # (huge per-image C*HW, mainly under v7x's 64 MiB VMEM), switch to a
    # two-pass HW-tiled variant (pass 1: pooled sums; pass 2: apply scale)
    # instead of relying on the cap above; that also gives N==1 a second
    # parallel grid axis so both v7x TensorCores get work.

    x_spec = pl.BlockSpec(block, lambda i: (i, 0, 0))
    # Constant-index weight blocks: single buffer -- double-buffering them only
    # wastes VMEM that is better spent on bigger activation blocks.
    w1_spec = pl.BlockSpec(w1.shape, lambda i: (0, 0),
                           pipeline_mode=pl.Buffered(1))
    w2_spec = pl.BlockSpec(w2.shape, lambda i: (0, 0),
                           pipeline_mode=pl.Buffered(1))

    cost = pl.CostEstimate(
        flops=int(N * (3 * C * HW + 4 * C * C_red)),
        transcendentals=int(N * C),                      # sigmoid
        bytes_accessed=int(2 * N * C * HW * elem + 2 * C * C_red * w_elem),
    )

    out3 = pl.pallas_call(
        kernel,
        out_shape=jax.ShapeDtypeStruct(x3.shape, x.dtype),
        grid_spec=pltpu.PrefetchScalarGridSpec(
            num_scalar_prefetch=0,
            grid=grid,
            in_specs=[x_spec, w1_spec, w2_spec],
            out_specs=pl.BlockSpec(block, lambda i: (i, 0, 0)),
        ),
        compiler_params=pltpu.CompilerParams(
            dimension_semantics=("parallel",),
            vmem_limit_bytes=vmem_limit,
        ),
        cost_estimate=cost,
        input_output_aliases=({0: 0} if alias_input else {}),
    )(x3, w1, w2)

    return out3.reshape(x.shape)


def _reference_nchw(x_nchw, w1, w2):
    # Pure-JAX reference mirroring the PyTorch forward (NCHW).
    pooled = jnp.mean(x_nchw, axis=(2, 3))               # (N, C)
    h = jnp.maximum(pooled @ w1.T, 0.0)                  # (N, C_red)
    s = jax.nn.sigmoid(h @ w2.T)                         # (N, C)
    return x_nchw * s[:, :, None, None]


if __name__ == "__main__":
    key = jax.random.PRNGKey(0)

    # --- Demo 1: early-stage SE shape, f32, NCHW (spatial on lanes).
    N, C, H, W = 2, 4, 16, 16
    r = 2
    kx, k1, k2, key = jax.random.split(key, 4)
    x = jax.random.normal(kx, (N, C, H, W), dtype=jnp.float32)
    w1 = jax.random.normal(k1, (C // r, C), dtype=jnp.float32) * (2.0 / C) ** 0.5
    w2 = jax.random.normal(k2, (C, C // r), dtype=jnp.float32) * (2.0 * r / C) ** 0.5
    out = jax.block_until_ready(se_module_forward(x, w1, w2))
    ref = _reference_nchw(x, w1, w2)
    assert out.shape == x.shape and out.dtype == x.dtype
    assert jnp.allclose(out, ref, atol=1e-5, rtol=1e-5), "demo1 f32 NCHW mismatch"

    # --- Demo 2: late-stage SE shape, bf16, *native* NHWC (channels on lanes,
    #     lane-dense stores; no transposes anywhere in the hot path).
    N2, C2, H2, W2 = 2, 128, 7, 7
    r2 = 4
    kx, k1, k2, key = jax.random.split(key, 4)
    x2 = jax.random.normal(kx, (N2, H2, W2, C2), dtype=jnp.float32).astype(jnp.bfloat16)
    w1b = jax.random.normal(k1, (C2 // r2, C2), dtype=jnp.float32) * (2.0 / C2) ** 0.5
    w2b = jax.random.normal(k2, (C2, C2 // r2), dtype=jnp.float32) * (2.0 * r2 / C2) ** 0.5
    out2 = jax.block_until_ready(
        se_module_forward(x2, w1b, w2b, data_format="NHWC"))
    ref2 = jnp.transpose(
        _reference_nchw(jnp.transpose(x2.astype(jnp.float32), (0, 3, 1, 2)),
                        w1b, w2b),
        (0, 2, 3, 1))
    assert out2.shape == x2.shape and out2.dtype == jnp.bfloat16
    err2 = jnp.max(jnp.abs(out2.astype(jnp.float32) - ref2))
    assert err2 < 5e-2, f"demo2 bf16 NHWC mismatch (max err {err2})"

    # --- Demo 3: f32 NCHW with batch packing exercised (blk_b = 4, grid = 2).
    N3, C3, H3, W3 = 8, 64, 14, 14
    r3 = 4
    kx, k1, k2, key = jax.random.split(key, 4)
    x3 = jax.random.normal(kx, (N3, C3, H3, W3), dtype=jnp.float32)
    w13 = jax.random.normal(k1, (C3 // r3, C3), dtype=jnp.float32) * (2.0 / C3) ** 0.5
    w23 = jax.random.normal(k2, (C3, C3 // r3), dtype=jnp.float32) * (2.0 * r3 / C3) ** 0.5
    out3 = jax.block_until_ready(se_module_forward(x3, w13, w23))
    ref3 = _reference_nchw(x3, w13, w23)
    assert out3.shape == x3.shape and out3.dtype == x3.dtype
    assert jnp.allclose(out3, ref3, atol=1e-4, rtol=1e-4), "demo3 f32 packed mismatch"

    print("KERNEL_OK")
</pallas_src>

<mosaic_0001>
module attributes {stable_mosaic.version = 11 : i64} {
  func.func @_se_kernel_nchw(%arg0: i32, %arg1: memref<1x4x256xf32, #tpu.memory_space<vmem>>, %arg2: memref<2x4xf32, #tpu.memory_space<vmem>>, %arg3: memref<4x2xf32, #tpu.memory_space<vmem>>, %arg4: memref<1x4x256xf32, #tpu.memory_space<vmem>>) attributes {dimension_semantics = [#tpu.dimension_semantics<parallel>], iteration_bounds = array<i64: 2>, scalar_prefetch = 0 : i64, scratch_operands = 0 : i64, tpu.core_type = #tpu.core_type<tc>, window_params = [{transform_indices = @transform_0, window_bounds = array<i64: 1, 4, 256>}, {pipeline_mode = #tpu.pipeline_mode<synchronous>, transform_indices = @transform_1, window_bounds = array<i64: 2, 4>}, {pipeline_mode = #tpu.pipeline_mode<synchronous>, transform_indices = @transform_2, window_bounds = array<i64: 4, 2>}, {transform_indices = @transform_3, window_bounds = array<i64: 1, 4, 256>}]} {
    %c0 = arith.constant 0 : index
    %c0_0 = arith.constant 0 : index
    %0 = vector.load %arg2[%c0, %c0_0] : memref<2x4xf32, #tpu.memory_space<vmem>>, vector<2x4xf32>
    %c0_1 = arith.constant 0 : index
    %c0_2 = arith.constant 0 : index
    %1 = vector.load %arg3[%c0_1, %c0_2] : memref<4x2xf32, #tpu.memory_space<vmem>>, vector<4x2xf32>
    %c0_3 = arith.constant 0 : index
    %c0_4 = arith.constant 0 : index
    %c0_5 = arith.constant 0 : index
    %2 = vector.load %arg1[%c0_3, %c0_4, %c0_5] : memref<1x4x256xf32, #tpu.memory_space<vmem>>, vector<1x4x256xf32>
    %3 = vector.shape_cast %2 : vector<1x4x256xf32> to vector<4x256xf32>
    %cst = arith.constant dense<0.000000e+00> : vector<4xf32>
    %4 = vector.multi_reduction <add>, %3, %cst [1] : vector<4x256xf32> to vector<4xf32>
    %5 = vector.shape_cast %4 : vector<4xf32> to vector<4x1xf32>
    %cst_6 = arith.constant 3.906250e-03 : f32
    %6 = vector.broadcast %cst_6 : f32 to vector<4x1xf32>
    %7 = arith.mulf %5, %6 : vector<4x1xf32>
    %cst_7 = arith.constant dense<0.000000e+00> : vector<2x1xf32>
    %8 = tpu.matmul %0, %7, %cst_7 {dimension_numbers = #tpu.dot_dimension_numbers<[1], [0], [0], [1], [0, 0, 1, 1], [], []>} : vector<2x4xf32>, vector<4x1xf32>, vector<2x1xf32> -> vector<2x1xf32>
    %cst_8 = arith.constant 0.000000e+00 : f32
    %9 = vector.broadcast %cst_8 : f32 to vector<2x1xf32>
    %10 = arith.maximumf %8, %9 : vector<2x1xf32>
    %cst_9 = arith.constant dense<0.000000e+00> : vector<4x1xf32>
    %11 = tpu.matmul %1, %10, %cst_9 {dimension_numbers = #tpu.dot_dimension_numbers<[1], [0], [0], [1], [0, 0, 1, 1], [], []>} : vector<4x2xf32>, vector<2x1xf32>, vector<4x1xf32> -> vector<4x1xf32>
    %12 = arith.negf %11 : vector<4x1xf32>
    %13 = math.exp %12 : vector<4x1xf32>
    %cst_10 = arith.constant 1.000000e+00 : f32
    %14 = vector.broadcast %cst_10 : f32 to vector<4x1xf32>
    %15 = arith.addf %14, %13 : vector<4x1xf32>
    %16 = arith.divf %14, %15 : vector<4x1xf32>
    %17 = vector.broadcast %16 : vector<4x1xf32> to vector<4x256xf32>
    %18 = arith.mulf %3, %17 : vector<4x256xf32>
    %c0_11 = arith.constant 0 : index
    %c0_12 = arith.constant 0 : index
    %c0_13 = arith.constant 0 : index
    %19 = vector.load %arg4[%c0_11, %c0_12, %c0_13] : memref<1x4x256xf32, #tpu.memory_space<vmem>>, vector<1x4x256xf32>
    %20 = vector.shape_cast %19 : vector<1x4x256xf32> to vector<4x256xf32>
    %21 = vector.shape_cast %18 : vector<4x256xf32> to vector<1x4x256xf32>
    tpu.vector_store %arg4[%c0_11, %c0_12, %c0_13], %21 {strides = array<i32>} : memref<1x4x256xf32, #tpu.memory_space<vmem>>, vector<1x4x256xf32>,
    return
  }
  func.func @transform_0(%arg0: i32) -> (i32, i32, i32) {
    %c0_i32 = arith.constant 0 : i32
    %c0_i32_0 = arith.constant 0 : i32
    %c0_i32_1 = arith.constant 0 : i32
    return %arg0, %c0_i32, %c0_i32_0 : i32, i32, i32
  }
  func.func @transform_1(%arg0: i32) -> (i32, i32) {
    %c0_i32 = arith.constant 0 : i32
    %c0_i32_0 = arith.constant 0 : i32
    %c0_i32_1 = arith.constant 0 : i32
    return %c0_i32, %c0_i32_0 : i32, i32
  }
  func.func @transform_2(%arg0: i32) -> (i32, i32) {
    %c0_i32 = arith.constant 0 : i32
    %c0_i32_0 = arith.constant 0 : i32
    %c0_i32_1 = arith.constant 0 : i32
    return %c0_i32, %c0_i32_0 : i32, i32
  }
  func.func @transform_3(%arg0: i32) -> (i32, i32, i32) {
    %c0_i32 = arith.constant 0 : i32
    %c0_i32_0 = arith.constant 0 : i32
    %c0_i32_1 = arith.constant 0 : i32
    return %arg0, %c0_i32, %c0_i32_0 : i32, i32, i32
  }
}

</mosaic_0001>

<bundles_post_ra>
// kernel: tpu_custom_call.1
= control target key start
LH: loop header
LB: loop body
LE: loop exit
PB: predicated region body
PF: predicated region fallthrough
CT: control target
= control target key end

     0   :  { %8 = vsyncpa [#allocation3], 0  ;;  %s709_s0 = inlined_call_operand.hbm [shape: f32[2,4,256], index: 0, kind: input, shape index: {}]   ;;  %s710_s1 = inlined_call_operand.vmem [shape: f32[2,4], index: 1, kind: input, shape index: {}]   ;;  %s711_s2 = inlined_call_operand.vmem [shape: f32[4,2], index: 2, kind: input, shape index: {}]   ;;  %s712_s3 = inlined_call_operand.hbm [shape: f32[2,4,256], index: 3, kind: output, shape index: {}]  }
   0x1   :  { %10 = vsyncpa [#allocation3 + $0x1], 0 }
   0x2   :  { %11 = vsyncpa [#allocation4], 0 }
   0x3   :  { %13 = vsyncpa [#allocation4 + $0x1], 0  ;;  %s572_s12 = smov 0   ;;  %s574_s13 = smov 0  }
   0x4   :  { %s576_s14 = smov 0   ;;  %s578_s15 = smov 0  }
   0x5 LB: > { %s593_s16 = sadd.s32 4294967295, %s548_s15   ;;  %s378_s17 = sadd.s32 4294967294, %s548_s15   ;;  %s548_s15 = sphi %s578_s15, %s722_s15   ;;  %s544_s14 = sphi %s576_s14, %s721_s14   ;;  %s540_s13 = sphi %s574_s13, %s720_s13   ;;  %s536_s12 = sphi %s572_s12, %s719_s12  }
   0x6   : > { %s597_s18 = sadd.s32 1, %s548_s15   ;;  %s26_s19 = sadd.s32 1, %s544_s14 }
   0x7   : > { %s23_s20 = ssub.s32 %s548_s15, %s597_s18  ;;  %p33_p0 = scmp.ne.s32.totalorder %s544_s14, %s540_s13 }
   0x8   : > { %p24_p1 = scmp.eq.s32.totalorder %s23_s20, 0  ;;  %p34_p2 = scmp.eq.s32.totalorder %s548_s15, 0 }
   0x9   : > { %p39_p3 = scmp.ne.s32.totalorder %s540_s13, %s536_s12  ;;  %p40_p4 = scmp.eq.s32.totalorder %s593_s16, 0 }
   0xa   : > { %s609_s21 = scalar_select %p24_p1, %s544_s14, %s26_s19  }
   0xb   : > { %p611_p5 = por %p34_p2, %p33_p0  ;;  %p615_p6 = por %p40_p4, %p39_p3 }
   0xc   : > { %p105_p7 = scmp.eq.s32.totalorder %s593_s16, 1  ;;  %p111_p8 = scmp.eq.s32.totalorder %s378_s17, 1 }
   0xd   : > { %p411_p10 = scmp.lt.s32.totalorder %s548_s15, 2  ;;  %s137_s26 = sand.u32 1, %s544_s14  }
   0xe   : > { %p622_p11 = por %p105_p7, %p33_p0  ;;  %p626_p12 = por %p111_p8, %p39_p3 }
   0xf   : > { %s397_s27 = sshll.u32 %s548_s15, 3  ;;  %s381_s28 = sshll.u32 %s137_s26, 3 }
  0x10   : > { %s146_s4 = scalar_lea.hbm %s709_s0, %s397_s27  ;;  %s141_s6 = scalar_lea.vmem [#allocation2], %s381_s28 }
  0x11   : > { %s148_s5 = sshll.u32 %s146_s4, 4  ;;  %s150_s7 = sshll.u32 %s141_s6, 4  ;;  %s149_s5 = int_to_ptr.hbm [resolvable:$true] %s148_s5  ;;  %s151_s7 = int_to_ptr.vmem [resolvable:$true] %s150_s7 }
  0x12   : > { %p637_p13 = pnand %p411_p10, %p611_p5  ;;  %p384_p0 = scmp.ge.s32.totalorder %s548_s15, 1 }
  0x13   : > { %p155_p1 = scmp.lt.s32.totalorder %s548_s15, 3  ;;  %s138_s9 = scalar_lea.sflag [#allocation3], %s137_s26 }
  0x14   : > { %s452_s10 = sshra.s32 %s149_s5, 4  ;;  %p456_p3 = pneg %p637_p13  ;;  %s453_s10 = int_to_ptr.hbm [resolvable:$true] %s452_s10 }
  0x15   : > { %s454_s11 = scalar_lea.hbm %s453_s10, 8  ;;  %s459_s20 = scalar_lea.hbm %s709_s0, 16 }
  0x16   : > { %p455_p2 = scmp.ne.s32.totalorder %s453_s10, %s454_s11  ;;  %p460_p5 = scmp.lt.s32.totalorder %s453_s10, %s709_s0 }
  0x17   : > { %p461_p8 = scmp.lt.s32.totalorder %s459_s20, %s454_s11 }
  0x18   : > { %p457_p4 = pnand %p456_p3, %p455_p2 }
  0x19   : > { %p462_p10 = por %p461_p8, %p460_p5 }
  0x1a   : > { %p458_p7 = pneg %p457_p4 }
  0x1c   : > { %p463_p9 = pnand %p462_p10, %p458_p7 }
  0x1e   : > { %466 = shalt.err (!%p463_p9)
}
  0x1f   : > { %406 = dma.hbm_to_vmem [thread:$0]  (!%p637_p13), %s149_s5, 128, %s151_s7, %s138_s9  }
  0x20   : > { %p156_p2 = pnand %p384_p0, %p155_p1 }
  0x21   : > { %s658_s26 = sand.u32 (!%p156_p2), 1, %s540_s13  }
  0x22   : > { %159 = sbr.rel (%p156_p2) target bundleno = 576 (0x240), region = 32  ;;  %s385_s28 = sshll.u32 (!%p156_p2), %s658_s26, 3 }
  0x23   : > { %s162_s29 = scalar_lea.sflag (!%p156_p2), [#allocation3], %s658_s26  ;;  %s165_s30 = scalar_lea.vmem (!%p156_p2), [#allocation2], %s385_s28 }
  0x27   : > { %527 = dma.done.wait (%p615_p6), %s162_s29, 128  }
  0x28   : > { %529 = vsyncadd (%p615_p6), %s162_s29, 4294967168  ;;  %v191_v0 = vld [vmem:[%s165_s30] sm:$0xff]  ;;  %vm198_vm0 = vcmask 1043456   ;;  %v189_v8 = vld [vmem:[%s710_s1] sm:$0x3]  ;;  %vm205_vm1 = vcmask 31744  }
  0x29   : > { %193 = vst [vmem:[#allocation1] ss:$2 sm:$0xff] %v191_v0  ;;  %vm237_vm2 = vcmask 1041408   ;;  %v190_v11 = vld [vmem:[%s711_s2] sm:$0xf]  ;;  %vm233_vm3 = vcmask 15360  }
  0x2a   : > { %v550_v12 = vmov 0   ;;  %v551_v27 = vmov 839922192   ;;  %s398_s7 = sshll.u32 %s593_s16, 3  ;;  %s188_s11 = scalar_lea.vmem [#allocation5], %s385_s28 }
  0x2b   : > { %447 = vset.pattern.permute.xlu0 %v550_v12  ;;  %v285_v28 = vunpack.c.l.s4 %v551_v27  ;;  %s303_s10 = scalar_lea.hbm %s712_s3, %s398_s7  ;;  %s305_s17 = sshll.u32 %s188_s11, 4  ;;  %s306_s17 = int_to_ptr.vmem [resolvable:$true] %s305_s17 }
  0x2c   : > { %s307_s19 = sshll.u32 %s303_s10, 4  ;;  %s292_s20 = scalar_lea.sflag [#allocation4], %s658_s26  ;;  %s308_s19 = int_to_ptr.hbm [resolvable:$true] %s307_s19 }
  0x2d   : > { %v286_v29 = vunpack.c.0.s8 %v285_v28  ;;  %s496_s22 = sshra.s32 %s308_s19, 4  ;;  %s502_s30 = scalar_lea.hbm %s712_s3, 16  ;;  %s497_s22 = int_to_ptr.hbm [resolvable:$true] %s496_s22 }
  0x2e   : > { %s498_s16 = scalar_lea.hbm %s497_s22, 8  ;;  %p503_p0 = scmp.lt.s32.totalorder %s497_s22, %s712_s3 }
  0x2f   : > { %p499_p6 = scmp.ne.s32.totalorder %s497_s22, %s498_s16  ;;  %p504_p1 = scmp.lt.s32.totalorder %s502_s30, %s498_s16 }
  0x30   : > { %v194_v1 = vld.sshfl [vmem:[#allocation1] sm:$0xff pattern:$0x75316420]  ;;  %v195_v2 = vld.sshfl [vmem:[#allocation1 + $0x8] sm:$0xff pattern:$0x75316420] }
  0x31   : > { %v199_v3 = vsel %vm198_vm0, %v194_v1, 0.0  ;;  %v200_v4 = vsel %vm198_vm0, %v195_v2, 0.0  ;;  %p500_p9 = pnand %p499_p6, %p622_p11  ;;  %p505_p3 = por %p504_p1, %p503_p0 }
  0x32   : > { %v201_v5 = vadd.f32 %v200_v4, %v199_v3 }
  0x33   : > { %p501_p13 = pneg %p500_p9 }
  0x34   : > { %202 = vadd.xlane.f32.xlu0 %v201_v5 }
  0x35   : > { %p506_p4 = pnand %p505_p3, %p501_p13 }
  0xa7   : > { %v203_v6 = vpop.xlane.xlu0 %202 }
  0xa8   : > { %v204_v7 = vmul.f32 0.00390625, %v203_v6 }
  0xaa   : > { %387 = vmatpush.msk.msra.mxu0 %vm198_vm0, %v204_v7 }
  0xab   : > { %388 = vmatmul.msk.f32.vlgmr.msra.gmra.mxu0 %vm205_vm1, %v189_v8 }
 0x128   : > { %v229_v9 = vpop.f32.mrf.mxu0 }
 0x129   : > { %v232_v10 = vmax.f32 %v229_v9, 0.0 }
 0x12b   : > { %389 = vmatpush.msk.msra.mxu1 %vm237_vm2, %v232_v10 }
 0x12c   : > { %390 = vmatmul.msk.f32.vlgmr.msra.gmra.mxu1 %vm233_vm3, %v190_v11 }
 0x1a9   : > { %v258_v13 = vpop.f32.mrf.mxu1 }
 0x1aa   : > { %v391_v14 = vmul.f32 -1.442695, %v258_v13 }
 0x1ac   : > { %448 = vpow2.f32 %v391_v14 }
 0x1b2   : > { %v449_v15 = vpop.eup %448 }
 0x1b3   : > { %v264_v16 = vadd.f32 1.0, %v449_v15 }
 0x1b5   : > { %450 = vrcp.f32 %v264_v16  ;;  %v276_v20 = vand.u32 2147483648, %v264_v16  ;;  %v274_v22 = vand.u32 2147483647, %v264_v16  ;;  %vm270_vm5 = vweird.f32 %v264_v16 }
 0x1b7   : > { %v277_v24 = vor.u32 1.1754944e-38, %v276_v20  ;;  %vm275_vm7 = vcmp.eq.f32.partialorder %v274_v22, 8.507059e+37 }
 0x1bb   : > { %v451_v17 = vpop.eup %450 }
 0x1bc   : > { %v266_v18 = vmul.f32 %v451_v17, %v264_v16  ;;  %vm271_vm4 = vweird.f32 %v451_v17 }
 0x1bd   : > { %vm272_vm6 = vmor %vm270_vm5, %vm271_vm4 }
 0x1be   : > { %v267_v19 = vsub.f32 1.0, %v266_v18 }
 0x1c0   : > { %v268_v21 = vmul.f32 %v451_v17, %v267_v19 }
 0x1c2   : > { %v269_v23 = vadd.f32 %v451_v17, %v268_v21 }
 0x1c4   : > { %v273_v25 = vsel %vm272_vm6, %v451_v17, %v269_v23 }
 0x1c5   : > { %v278_v26 = vsel %vm275_vm7, %v277_v24, %v273_v25 }
 0x1c6   : > { %282 = vperm.xlu0 %447, %v278_v26  }
 0x238   : > { %v283_v30 = vpop.permute.xlu0 %282 }
 0x239   : > { %v287_v31 = vperm.slane %v283_v30, %v286_v29 }
 0x23b   : > { %v289_v32 = vmul.f32 %v287_v31, %v191_v0 }
 0x23d   : > { %290 = vst [vmem:[%s188_s11] sm:$0xff] %v289_v32 }
 0x23e   : > { %509 = shalt.err (!%p506_p4)
}
 0x23f   : > { %401 = dma.vmem_to_hbm [thread:$0]  (%p622_p11), %s306_s17, 128, %s308_s19, %s292_s20  }
 0x240 PF: > { %s319_s26 = sand.u32 1, %s536_s12   ;;  %p718_p7 = scmp.ge.s32.totalorder %s548_s15, 2 }
 0x241   : > { %s320_s5 = scalar_lea.sflag [#allocation4], %s319_s26 }
 0x242   : > { %p408_p5 = pnand %p718_p7, %p626_p12 }
 0x244   : > { %p409_p8 = pneg %p408_p5 }
 0x246   : > { %531 = dma.done.wait (%p409_p8), %s320_s5, 128  }
 0x247   : > { %533 = vsyncadd (%p409_p8), %s320_s5, 4294967168  ;;  %p16_p10 = scmp.ge.s32.totalorder %s597_s18, 4   ;;  %s719_s12 = smov %s540_s13 }
 0x248   : > { %s720_s13 = smov %s544_s14  ;;  %s721_s14 = smov %s609_s21 }
 0x249   : > { %s722_s15 = smov %s597_s18  ;;  %18 = sbr.rel (!%p16_p10) target bundleno = 5 (0x5), region = 77 }
 0x24e   :  { %326 = vsyncpa [#allocation3], 1 }
 0x24f   :  { %328 = vsyncpa [#allocation3 + $0x1], 1 }
 0x250   :  { %329 = vsyncpa [#allocation4], 1 }
 0x251   :  { %331 = vsyncpa [#allocation4 + $0x1], 1 }

</bundles_post_ra>
